<compile_context>
chip_gen: v7x
topology: tpu7x:2x2x1
jax: 0.10.0
libtpu: 0.0.40
codegen_flags: <defaults>
</compile_context>

<pallas_src>
import jax
import jax.numpy as jnp
from jax.experimental import pallas as pl
from jax.experimental.pallas import tpu as pltpu


IN_DIM = 28 * 28          # 784 (multiple of 8 -> clean sublane layout, no pad)
HIDDEN = 128
OUT_DIM = 10
N_PAD = 128               # fc2 output lanes, zero-padded (lane-dense stores)
TB_CAP = 1024             # max batch-tile rows (f32 x tile: 3.1 MiB/buffer)
NEG_BIG = -1e30           # bias value for padded logit lanes (acts as -inf)


def _round_up(x, m):
    return ((x + m - 1) // m) * m


def _pick_batch_tile(B):
    """Batch tile: multiple of 8, capped; >=2 tiles for mid/large batches so
    both v7x TensorCores get work (harmless on single-TC v5e/v6e)."""
    if B <= 256:
        return _round_up(max(B, 1), 8)
    return min(TB_CAP, _round_up(pl.cdiv(B, 2), 8))


def _simple_nn_kernel(x_ref, w1_ref, b1_ref, w2_ref, b2_ref, out_ref):
    # x_ref:  (TB, 784) f32     w1_ref: (784, 128) bf16   b1_ref: (1, 128) f32
    # w2_ref: (128, 128) bf16   b2_ref: (1, 128) f32 (padded lanes = -1e30)
    # out_ref: (TB, 128) bf16

    # Cast the activation tile to bf16 in VMEM (MXU bf16 operands, f32 acc).
    x = x_ref[...].astype(jnp.bfloat16)

    # fc1 + ReLU
    h = jnp.dot(x, w1_ref[...], preferred_element_type=jnp.float32)
    h = jnp.maximum(h + b1_ref[...], 0.0)

    # fc2 (N padded to 128 lanes; padded lanes masked via the -1e30 bias)
    logits = jnp.dot(h.astype(jnp.bfloat16), w2_ref[...],
                     preferred_element_type=jnp.float32)
    logits = logits + b2_ref[...]

    # Numerically stable log-softmax over dim=1 (lanes). Padded lanes hold
    # ~-1e30, so they contribute exp(...) == 0 to the reduction.
    m = jnp.max(logits, axis=1, keepdims=True)
    shifted = logits - m
    lse = jnp.log(jnp.sum(jnp.exp(shifted), axis=1, keepdims=True))
    out_ref[...] = (shifted - lse).astype(out_ref.dtype)


def prepare_params(w1, b1, w2, b2):
    """One-time parameter prep (pad/cast hoisted out of the forward path)."""
    w1_p = w1.astype(jnp.bfloat16)                                  # (784, 128)
    b1_p = b1.reshape(1, HIDDEN).astype(jnp.float32)                # (1, 128)
    w2_p = jnp.zeros((HIDDEN, N_PAD), jnp.bfloat16)
    w2_p = w2_p.at[:, :OUT_DIM].set(w2.astype(jnp.bfloat16))        # (128, 128)
    b2_p = jnp.full((1, N_PAD), NEG_BIG, jnp.float32)
    b2_p = b2_p.at[:, :OUT_DIM].set(b2.reshape(1, OUT_DIM).astype(jnp.float32))
    return w1_p, b1_p, w2_p, b2_p


def simple_nn_forward(x, params):
    """x: (B, 1, 28, 28) or (B, 784). Returns (B, 10) log-probs (f32)."""
    w1_p, b1_p, w2_p, b2_p = params

    x2d = x.reshape(-1, IN_DIM)
    if x2d.dtype != jnp.float32:
        x2d = x2d.astype(jnp.float32)
    B = x2d.shape[0]

    TB = _pick_batch_tile(B)
    num_tiles = pl.cdiv(B, TB)
    B_pad = num_tiles * TB
    if B_pad != B:
        # Only the batch dim is padded (zeros); no K padding, no dtype copy.
        x2d = jnp.pad(x2d, ((0, B_pad - B), (0, 0)))

    cost = pl.CostEstimate(
        flops=2 * B_pad * (IN_DIM * HIDDEN + HIDDEN * N_PAD),
        transcendentals=B_pad * (N_PAD + 1),
        bytes_accessed=(B_pad * IN_DIM * 4            # x (f32 read)
                        + IN_DIM * HIDDEN * 2         # w1 (bf16)
                        + HIDDEN * N_PAD * 2          # w2 (bf16)
                        + (HIDDEN + N_PAD) * 4        # biases (f32)
                        + B_pad * N_PAD * 2),         # out (bf16 write)
    )

    out_padded = pl.pallas_call(
        _simple_nn_kernel,
        out_shape=jax.ShapeDtypeStruct((B_pad, N_PAD), jnp.bfloat16),
        grid=(num_tiles,),
        in_specs=[
            pl.BlockSpec((TB, IN_DIM), lambda i: (i, 0)),        # x tile (f32)
            pl.BlockSpec((IN_DIM, HIDDEN), lambda i: (0, 0)),    # w1 (resident)
            pl.BlockSpec((1, HIDDEN), lambda i: (0, 0)),         # b1 (resident)
            pl.BlockSpec((HIDDEN, N_PAD), lambda i: (0, 0)),     # w2 (resident)
            pl.BlockSpec((1, N_PAD), lambda i: (0, 0)),          # b2 (resident)
        ],
        out_specs=pl.BlockSpec((TB, N_PAD), lambda i: (i, 0)),
        compiler_params=pltpu.CompilerParams(
            dimension_semantics=("parallel",)),
        cost_estimate=cost,
    )(x2d, w1_p, b1_p, w2_p, b2_p)

    # Drop batch padding and padded logit lanes; return f32 like the torch ref.
    return out_padded[:B, :OUT_DIM].astype(jnp.float32)


def init_params(key):
    """Deterministic init mimicking nn.Linear's uniform(-1/sqrt(fan_in), ...)."""
    k1, k2, k3, k4 = jax.random.split(key, 4)
    bound1 = 1.0 / jnp.sqrt(784.0)
    bound2 = 1.0 / jnp.sqrt(128.0)
    w1 = jax.random.uniform(k1, (IN_DIM, HIDDEN), jnp.float32, -bound1, bound1)
    b1 = jax.random.uniform(k2, (HIDDEN,), jnp.float32, -bound1, bound1)
    w2 = jax.random.uniform(k3, (HIDDEN, OUT_DIM), jnp.float32, -bound2, bound2)
    b2 = jax.random.uniform(k4, (OUT_DIM,), jnp.float32, -bound2, bound2)
    return w1, b1, w2, b2


if __name__ == "__main__":
    key = jax.random.PRNGKey(0)
    kx, kp = jax.random.split(key)

    # Small batch of MNIST-shaped inputs (NCHW, like PyTorch would feed).
    x = jax.random.normal(kx, (2, 1, 28, 28), jnp.float32)
    w1, b1, w2, b2 = init_params(kp)
    params = prepare_params(w1, b1, w2, b2)   # one-time pad/cast

    out = simple_nn_forward(x, params)
    out = jax.block_until_ready(out)

    # Sanity: log_softmax rows should exponentiate-and-sum to ~1.
    # (Tolerance reflects bf16 operands / bf16 output.)
    row_sums = jnp.sum(jnp.exp(out), axis=1)
    assert out.shape == (2, 10)
    assert bool(jnp.all(jnp.isfinite(out)))
    assert jnp.allclose(row_sums, 1.0, atol=5e-2)

    print("KERNEL_OK")
</pallas_src>

<mosaic_0001>
module attributes {stable_mosaic.version = 11 : i64} {
  func.func @_simple_nn_kernel(%arg0: i32, %arg1: memref<8x784xf32, #tpu.memory_space<vmem>>, %arg2: memref<784x128xbf16, #tpu.memory_space<vmem>>, %arg3: memref<1x128xf32, #tpu.memory_space<vmem>>, %arg4: memref<128x128xbf16, #tpu.memory_space<vmem>>, %arg5: memref<1x128xf32, #tpu.memory_space<vmem>>, %arg6: memref<8x128xbf16, #tpu.memory_space<vmem>>) attributes {dimension_semantics = [#tpu.dimension_semantics<parallel>], iteration_bounds = array<i64: 1>, scalar_prefetch = 0 : i64, scratch_operands = 0 : i64, tpu.core_type = #tpu.core_type<tc>, window_params = [{transform_indices = @transform_0, window_bounds = array<i64: 8, 784>}, {pipeline_mode = #tpu.pipeline_mode<synchronous>, transform_indices = @transform_1, window_bounds = array<i64: 784, 128>}, {pipeline_mode = #tpu.pipeline_mode<synchronous>, transform_indices = @transform_2, window_bounds = array<i64: 1, 128>}, {pipeline_mode = #tpu.pipeline_mode<synchronous>, transform_indices = @transform_3, window_bounds = array<i64: 128, 128>}, {pipeline_mode = #tpu.pipeline_mode<synchronous>, transform_indices = @transform_4, window_bounds = array<i64: 1, 128>}, {transform_indices = @transform_5, window_bounds = array<i64: 8, 128>}]} {
    %c0 = arith.constant 0 : index
    %c0_0 = arith.constant 0 : index
    %0 = vector.load %arg1[%c0, %c0_0] : memref<8x784xf32, #tpu.memory_space<vmem>>, vector<8x784xf32>
    %1 = arith.truncf %0 : vector<8x784xf32> to vector<8x784xbf16>
    %c0_1 = arith.constant 0 : index
    %c0_2 = arith.constant 0 : index
    %2 = vector.load %arg2[%c0_1, %c0_2] : memref<784x128xbf16, #tpu.memory_space<vmem>>, vector<784x128xbf16>
    %cst = arith.constant dense<0.000000e+00> : vector<8x128xf32>
    %3 = tpu.matmul %1, %2, %cst {dimension_numbers = #tpu.dot_dimension_numbers<[1], [0], [0], [1], [0, 0, 1, 1], [], []>} : vector<8x784xbf16>, vector<784x128xbf16>, vector<8x128xf32> -> vector<8x128xf32>
    %c0_3 = arith.constant 0 : index
    %c0_4 = arith.constant 0 : index
    %4 = vector.load %arg3[%c0_3, %c0_4] : memref<1x128xf32, #tpu.memory_space<vmem>>, vector<1x128xf32>
    %5 = vector.broadcast %4 : vector<1x128xf32> to vector<8x128xf32>
    %6 = arith.addf %3, %5 : vector<8x128xf32>
    %cst_5 = arith.constant 0.000000e+00 : f32
    %7 = vector.broadcast %cst_5 : f32 to vector<8x128xf32>
    %8 = arith.maximumf %6, %7 : vector<8x128xf32>
    %9 = arith.truncf %8 : vector<8x128xf32> to vector<8x128xbf16>
    %c0_6 = arith.constant 0 : index
    %c0_7 = arith.constant 0 : index
    %10 = vector.load %arg4[%c0_6, %c0_7] : memref<128x128xbf16, #tpu.memory_space<vmem>>, vector<128x128xbf16>
    %cst_8 = arith.constant dense<0.000000e+00> : vector<8x128xf32>
    %11 = tpu.matmul %9, %10, %cst_8 {dimension_numbers = #tpu.dot_dimension_numbers<[1], [0], [0], [1], [0, 0, 1, 1], [], []>} : vector<8x128xbf16>, vector<128x128xbf16>, vector<8x128xf32> -> vector<8x128xf32>
    %c0_9 = arith.constant 0 : index
    %c0_10 = arith.constant 0 : index
    %12 = vector.load %arg5[%c0_9, %c0_10] : memref<1x128xf32, #tpu.memory_space<vmem>>, vector<1x128xf32>
    %13 = vector.broadcast %12 : vector<1x128xf32> to vector<8x128xf32>
    %14 = arith.addf %11, %13 : vector<8x128xf32>
    %cst_11 = arith.constant dense<0xFF800000> : vector<8xf32>
    %15 = vector.multi_reduction <maximumf>, %14, %cst_11 [1] : vector<8x128xf32> to vector<8xf32>
    %16 = vector.shape_cast %15 : vector<8xf32> to vector<8x1xf32>
    %17 = vector.broadcast %16 : vector<8x1xf32> to vector<8x128xf32>
    %18 = arith.subf %14, %17 : vector<8x128xf32>
    %19 = math.exp %18 : vector<8x128xf32>
    %cst_12 = arith.constant dense<0.000000e+00> : vector<8xf32>
    %20 = vector.multi_reduction <add>, %19, %cst_12 [1] : vector<8x128xf32> to vector<8xf32>
    %21 = vector.shape_cast %20 : vector<8xf32> to vector<8x1xf32>
    %22 = math.log %21 : vector<8x1xf32>
    %23 = vector.broadcast %22 : vector<8x1xf32> to vector<8x128xf32>
    %24 = arith.subf %18, %23 : vector<8x128xf32>
    %25 = arith.truncf %24 : vector<8x128xf32> to vector<8x128xbf16>
    %c0_13 = arith.constant 0 : index
    %c0_14 = arith.constant 0 : index
    %26 = vector.load %arg6[%c0_13, %c0_14] : memref<8x128xbf16, #tpu.memory_space<vmem>>, vector<8x128xbf16>
    tpu.vector_store %arg6[%c0_13, %c0_14], %25 {strides = array<i32>} : memref<8x128xbf16, #tpu.memory_space<vmem>>, vector<8x128xbf16>,
    return
  }
  func.func @transform_0(%arg0: i32) -> (i32, i32) {
    %c0_i32 = arith.constant 0 : i32
    %c0_i32_0 = arith.constant 0 : i32
    return %arg0, %c0_i32 : i32, i32
  }
  func.func @transform_1(%arg0: i32) -> (i32, i32) {
    %c0_i32 = arith.constant 0 : i32
    %c0_i32_0 = arith.constant 0 : i32
    %c0_i32_1 = arith.constant 0 : i32
    return %c0_i32, %c0_i32_0 : i32, i32
  }
  func.func @transform_2(%arg0: i32) -> (i32, i32) {
    %c0_i32 = arith.constant 0 : i32
    %c0_i32_0 = arith.constant 0 : i32
    %c0_i32_1 = arith.constant 0 : i32
    return %c0_i32, %c0_i32_0 : i32, i32
  }
  func.func @transform_3(%arg0: i32) -> (i32, i32) {
    %c0_i32 = arith.constant 0 : i32
    %c0_i32_0 = arith.constant 0 : i32
    %c0_i32_1 = arith.constant 0 : i32
    return %c0_i32, %c0_i32_0 : i32, i32
  }
  func.func @transform_4(%arg0: i32) -> (i32, i32) {
    %c0_i32 = arith.constant 0 : i32
    %c0_i32_0 = arith.constant 0 : i32
    %c0_i32_1 = arith.constant 0 : i32
    return %c0_i32, %c0_i32_0 : i32, i32
  }
  func.func @transform_5(%arg0: i32) -> (i32, i32) {
    %c0_i32 = arith.constant 0 : i32
    %c0_i32_0 = arith.constant 0 : i32
    return %arg0, %c0_i32 : i32, i32
  }
}

</mosaic_0001>

<bundles_post_ra>
// kernel: tpu_custom_call.1
= control target key start
LH: loop header
LB: loop body
LE: loop exit
PB: predicated region body
PF: predicated region fallthrough
CT: control target
= control target key end

     0   :  { %10 = vsyncpa [#allocation3], 0  ;;  %s1216_s0 = inlined_call_operand.hbm [shape: f32[8,784], index: 0, kind: input, shape index: {}]   ;;  %s1217_s1 = inlined_call_operand.hbm [shape: bf16[784,128], index: 1, kind: input, shape index: {}]   ;;  %s1218_s2 = inlined_call_operand.vmem [shape: f32[1,128], index: 2, kind: input, shape index: {}]   ;;  %s1219_s3 = inlined_call_operand.hbm [shape: bf16[128,128], index: 3, kind: input, shape index: {}]   ;;  %s1220_s4 = inlined_call_operand.vmem [shape: f32[1,128], index: 4, kind: input, shape index: {}]   ;;  %s1221_s5 = inlined_call_operand.hbm [shape: bf16[8,128], index: 5, kind: output, shape index: {}]  }
   0x1   :  { %11 = vsyncpa [#allocation6], 0 }
   0x2   :  { %12 = vsyncpa [#allocation4], 0  ;;  %s1105_s18 = smov [#allocation5]   ;;  %s1011_s22 = scalar_lea.hbm %s1217_s1, 6272 }
   0x3   :  { %s28_s19 = sshll.u32 %s1105_s18, 4  ;;  %p1012_p0 = scmp.ne.s32.totalorder %s1217_s1, %s1011_s22  ;;  %s29_s19 = int_to_ptr.vmem [resolvable:$true] %s28_s19 }
   0x4   :  { %p1015_p1 = scmp.lt.u32.totalorder %s1011_s22, %s1217_s1 }
   0x6   :  { %p1017_p2 = pnand %p1015_p1, %p1012_p0 }
   0x8   :  { %1020 = shalt.err (!%p1017_p2)
}
   0x9   :  { %s1021_s27 = scalar_lea.vmem %s29_s19, 6272  ;;  %p1026_p4 = scmp.lt.s32.totalorder %s29_s19, %s29_s19 }
   0xa   :  { %p1022_p3 = scmp.ne.s32.totalorder %s29_s19, %s1021_s27  ;;  %p1027_p5 = scmp.lt.s32.totalorder %s1021_s27, %s1021_s27 }
   0xc   :  { %p1028_p6 = por %p1027_p5, %p1026_p4 }
   0xe   :  { %p1029_p7 = pnand %p1028_p6, %p1022_p3 }
  0x10   :  { %1032 = shalt.err (!%p1029_p7)
}
  0x11   :  { %s1106_s28 = smov 64   ;;  %s1107_s29 = smov 4  }
  0x12   :  { %34 = dma.hbm_to_vmem [thread:$0]  %s1217_s1, 6272, %s29_s19, [#allocation6], %s1106_s28, %s1106_s28, %s1107_s29  }
  0x13   :  { %s1108_s7 = smov [#allocation2]   ;;  %s1109_s9 = smov [#allocation7]  }
  0x14   :  { %s19_s8 = sshll.u32 %s1108_s7, 4  ;;  %s42_s10 = sshll.u32 %s1109_s9, 4  ;;  %s20_s8 = int_to_ptr.vmem [resolvable:$true] %s19_s8  ;;  %s43_s10 = int_to_ptr.vmem [resolvable:$true] %s42_s10 }
  0x15   :  { %s1033_s13 = scalar_lea.hbm %s1216_s0, 896 }
  0x16   :  { %p1034_p8 = scmp.ne.s32.totalorder %s1216_s0, %s1033_s13  ;;  %p1037_p9 = scmp.lt.u32.totalorder %s1033_s13, %s1216_s0 }
  0x18   :  { %p1039_p10 = pnand %p1037_p9, %p1034_p8 }
  0x1a   :  { %1042 = shalt.err (!%p1039_p10)
}
  0x1b   :  { %s1043_s1 = scalar_lea.vmem %s20_s8, 896  ;;  %p1048_p12 = scmp.lt.s32.totalorder %s20_s8, %s20_s8 }
  0x1c   :  { %p1044_p11 = scmp.ne.s32.totalorder %s20_s8, %s1043_s1  ;;  %p1049_p13 = scmp.lt.s32.totalorder %s1043_s1, %s1043_s1 }
  0x1e   :  { %p1050_p0 = por %p1049_p13, %p1048_p12 }
  0x20   :  { %p1051_p1 = pnand %p1050_p0, %p1044_p11 }
  0x22   :  { %1054 = shalt.err (!%p1051_p1)
}
  0x23   :  { %22 = dma.hbm_to_vmem [thread:$0]  %s1216_s0, 896, %s20_s8, [#allocation3]  }
  0x24   :  { %s1055_s22 = scalar_lea.hbm %s1219_s3, 1024 }
  0x25   :  { %p1056_p2 = scmp.ne.s32.totalorder %s1219_s3, %s1055_s22  ;;  %p1059_p3 = scmp.lt.u32.totalorder %s1055_s22, %s1219_s3 }
  0x27   :  { %p1061_p4 = pnand %p1059_p3, %p1056_p2 }
  0x29   :  { %1064 = shalt.err (!%p1061_p4)
}
  0x2a   :  { %s1065_s27 = scalar_lea.vmem %s43_s10, 1024  ;;  %p1070_p6 = scmp.lt.s32.totalorder %s43_s10, %s43_s10 }
  0x2b   :  { %p1066_p5 = scmp.ne.s32.totalorder %s43_s10, %s1065_s27  ;;  %p1071_p7 = scmp.lt.s32.totalorder %s1065_s27, %s1065_s27 }
  0x2d   :  { %p1072_p8 = por %p1071_p7, %p1070_p6 }
  0x2f   :  { %p1073_p9 = pnand %p1072_p8, %p1066_p5 }
  0x31   :  { %1076 = shalt.err (!%p1073_p9)
}
  0x32   :  { %48 = dma.hbm_to_vmem [thread:$0]  %s1219_s3, 1024, %s43_s10, [#allocation6], %s1106_s28, %s1106_s28, %s1107_s29  }
  0x33   :  { %1099 = dma.done.wait [#allocation3], 896  }
  0x34   :  { %1100 = vsyncadd [#allocation3], 4294966400 }
  0x35   :  { %1101 = dma.done.wait [#allocation6], 7296  }
  0x36   :  { %1102 = vsyncadd [#allocation6], 4294960000  ;;  %v950_v0 = vld [vmem:[#allocation5 + $0x40] sm:$0xff]   ;;  %v954_v4 = vld [vmem:[#allocation5 + $0x48] sm:$0xff]   ;;  %v1110_v44 = vmov 0.0   ;;  %vm1111_vm0 = vmmov 0  }
  0x37   :  { %v951_v1 = vld [vmem:[#allocation5] sm:$0xff]   ;;  %839 = vmatprep.subr.bf16.mxu0 %v950_v0  ;;  %v955_v5 = vld [vmem:[#allocation5 + $0x8] sm:$0xff]   ;;  %v958_v8 = vld [vmem:[#allocation5 + $0x50] sm:$0xff]   ;;  %vm474_vm1 = vcmask 130048   ;;  %s1112_s6 = smov [#allocation8]  }
  0x38   :  { %v952_v2 = vld [vmem:[#allocation5 + $0xc0] sm:$0xff]   ;;  %840 = vmatpush3.bf16.msra.mxu0 %v951_v1  ;;  %v956_v6 = vld [vmem:[#allocation5 + $0xc8] sm:$0xff]   ;;  %v959_v9 = vld [vmem:[#allocation5 + $0x10] sm:$0xff]   ;;  %s769_s7 = sshll.u32 %s1112_s6, 4  ;;  %s770_s7 = int_to_ptr.vmem [resolvable:$true] %s769_s7 }
  0x39   :  { %v953_v3 = vld [vmem:[#allocation5 + $0x80] sm:$0xff]   ;;  %861 = vmatprep.subr.bf16.mxu1 %v952_v2  ;;  %841 = vmatprep.subr.bf16.mxu0 %v954_v4  ;;  %v957_v7 = vld [vmem:[#allocation5 + $0x88] sm:$0xff]   ;;  %v960_v10 = vld [vmem:[#allocation5 + $0xd0] sm:$0xff]   ;;  %p1082_p11 = scmp.lt.s32.totalorder %s770_s7, %s770_s7 }
  0x3a   :  { %862 = vmatpush3.bf16.msra.mxu1 %v953_v3  ;;  %v961_v11 = vld [vmem:[#allocation5 + $0x90] sm:$0xff]   ;;  %v962_v12 = vld [vmem:[#allocation5 + $0x58] sm:$0xff]   ;;  %v966_v16 = vld [vmem:[#allocation5 + $0x60] sm:$0xff]  }
  0x3b   :  { %863 = vmatprep.subr.bf16.mxu1 %v956_v6  ;;  %v963_v13 = vld [vmem:[#allocation5 + $0x18] sm:$0xff]   ;;  %v967_v17 = vld [vmem:[#allocation5 + $0x20] sm:$0xff]   ;;  %v970_v20 = vld [vmem:[#allocation5 + $0x68] sm:$0xff]  }
  0x3c   :  { %842 = vmatpush3.bf16.msra.mxu0 %v955_v5  ;;  %v964_v14 = vld [vmem:[#allocation5 + $0xd8] sm:$0xff]   ;;  %v968_v18 = vld [vmem:[#allocation5 + $0xe0] sm:$0xff]   ;;  %v971_v21 = vld [vmem:[#allocation5 + $0x28] sm:$0xff]  }
  0x3d   :  { %843 = vmatprep.subr.bf16.mxu0 %v958_v8  ;;  %v965_v15 = vld [vmem:[#allocation5 + $0x98] sm:$0xff]   ;;  %v969_v19 = vld [vmem:[#allocation5 + $0xa0] sm:$0xff]   ;;  %v972_v22 = vld [vmem:[#allocation5 + $0xe8] sm:$0xff]  }
  0x3e   :  { %864 = vmatpush3.bf16.msra.mxu1 %v957_v7  ;;  %v973_v23 = vld [vmem:[#allocation5 + $0xa8] sm:$0xff]   ;;  %v974_v24 = vld [vmem:[#allocation5 + $0x70] sm:$0xff]   ;;  %v978_v28 = vld [vmem:[#allocation5 + $0x78] sm:$0xff]  }
  0x3f   :  { %865 = vmatprep.subr.bf16.mxu1 %v960_v10  ;;  %v975_v25 = vld [vmem:[#allocation5 + $0x30] sm:$0xff]   ;;  %v979_v29 = vld [vmem:[#allocation5 + $0x38] sm:$0xff]   ;;  %v61_v34 = vld [vmem:[#allocation2] sm:$0xff] }
  0x40   :  { %844 = vmatpush3.bf16.msra.mxu0 %v959_v9  ;;  %v976_v26 = vld [vmem:[#allocation5 + $0xf0] sm:$0xff]   ;;  %v980_v30 = vld [vmem:[#allocation5 + $0xf8] sm:$0xff]   ;;  %v68_v35 = vpack.c.bf16 %v61_v34, %v61_v34  ;;  %v982_v36 = vld [vmem:[#allocation5 + $0x140] sm:$0xff]  }
  0x41   :  { %845 = vmatprep.subr.bf16.mxu0 %v962_v12  ;;  %v977_v27 = vld [vmem:[#allocation5 + $0xb0] sm:$0xff]   ;;  %v981_v33 = vld [vmem:[#allocation5 + $0xb8] sm:$0xff]   ;;  %v64_v37 = vld [vmem:[#allocation2 + $0x18] sm:$0xff] }
  0x42   :  { %866 = vmatpush3.bf16.msra.mxu1 %v961_v11  ;;  %v62_v31 = vld [vmem:[#allocation2 + $0x8] sm:$0xff]  ;;  %v71_v38 = vpack.c.bf16 %v64_v37, %v64_v37  ;;  %v983_v39 = vld [vmem:[#allocation5 + $0x100] sm:$0xff]   ;;  %v63_v40 = vld [vmem:[#allocation2 + $0x10] sm:$0xff] }
  0x43   :  { %867 = vmatprep.subr.bf16.mxu1 %v964_v14  ;;  %v69_v32 = vpack.c.bf16 %v62_v31, %v62_v31  ;;  %v70_v41 = vpack.c.bf16 %v63_v40, %v63_v40  ;;  %v984_v42 = vld [vmem:[#allocation5 + $0x148] sm:$0xff]   ;;  %v986_v45 = vld [vmem:[#allocation5 + $0x150] sm:$0xff]   ;;  %v988_v47 = vld [vmem:[#allocation5 + $0x158] sm:$0xff]  }
  0x44   :  { %846 = vmatpush3.bf16.msra.mxu0 %v963_v13  ;;  %550 = vmatprep.mubr.bf16.mxu1 %v71_v38  ;;  %v985_v43 = vld [vmem:[#allocation5 + $0x108] sm:$0xff]   ;;  %v987_v46 = vld [vmem:[#allocation5 + $0x110] sm:$0xff]   ;;  %v989_v48 = vld [vmem:[#allocation5 + $0x118] sm:$0xff]  }
  0x45   :  { %847 = vmatprep.subr.bf16.mxu0 %v966_v16  ;;  %510 = vmatprep.mubr.bf16.mxu0 %v69_v32  ;;  %v990_v49 = vld [vmem:[#allocation5 + $0x160] sm:$0xff]   ;;  %v992_v51 = vld [vmem:[#allocation5 + $0x168] sm:$0xff]   ;;  %v66_v54 = vld [vmem:[#allocation2 + $0x28] sm:$0xff] }
  0x46   :  { %868 = vmatpush3.bf16.msra.mxu1 %v965_v15  ;;  %v991_v50 = vld [vmem:[#allocation5 + $0x120] sm:$0xff]   ;;  %v993_v52 = vld [vmem:[#allocation5 + $0x128] sm:$0xff]   ;;  %v994_v55 = vld [vmem:[#allocation5 + $0x170] sm:$0xff]   ;;  %v73_v56 = vpack.c.bf16 %v66_v54, %v66_v54 }
  0x47   :  { %869 = vmatprep.subr.bf16.mxu1 %v968_v18  ;;  %v998_v53 = vld [vmem:[#allocation5 + $0x180] sm:$0xff]   ;;  %v67_v57 = vld [vmem:[#allocation2 + $0x30] sm:$0xff]  ;;  %v995_v59 = vld [vmem:[#allocation5 + $0x130] sm:$0xff]  }
  0x48   :  { %848 = vmatpush3.bf16.msra.mxu0 %v967_v17  ;;  %v74_v58 = vpack.c.bf16 %v67_v57, %v67_v57  ;;  %v996_v60 = vld [vmem:[#allocation5 + $0x178] sm:$0xff]   ;;  %v65_v62 = vld [vmem:[#allocation2 + $0x20] sm:$0xff]  ;;  %v1000_v1 = vld [vmem:[#allocation7 + $0x8] sm:$0xff]  }
  0x49   :  { %849 = vmatprep.subr.bf16.mxu0 %v970_v20  ;;  %v997_v61 = vld [vmem:[#allocation5 + $0x138] sm:$0xff]   ;;  %v72_v63 = vpack.c.bf16 %v65_v62, %v65_v62  ;;  %v999_v0 = vld [vmem:[#allocation7] sm:$0xff]   ;;  %v1002_v3 = vld [vmem:[#allocation7 + $0x18] sm:$0xff]  }
  0x4a   :  { %870 = vmatpush3.bf16.msra.mxu1 %v969_v19  ;;  %v1001_v2 = vld [vmem:[#allocation7 + $0x10] sm:$0xff]   ;;  %v1003_v4 = vld [vmem:[#allocation7 + $0x20] sm:$0xff]   ;;  %v1004_v5 = vld [vmem:[#allocation7 + $0x28] sm:$0xff]  }
  0x4b   :  { %871 = vmatprep.subr.bf16.mxu1 %v972_v22  ;;  %v1005_v6 = vld [vmem:[#allocation7 + $0x30] sm:$0xff]   ;;  %v1006_v7 = vld [vmem:[#allocation7 + $0x38] sm:$0xff]   ;;  %v779_v9 = vld [vmem:[%s1218_s2] ss:$0 sm:$0xff] }
  0x4c   :  { %850 = vmatpush3.bf16.msra.mxu0 %v971_v21  ;;  %v830_v34 = vld [vmem:[%s1220_s4] ss:$0 sm:$0xff]  ;;  %s1077_s4 = scalar_lea.vmem %s770_s7, 64 }
  0x4d   :  { %851 = vmatprep.subr.bf16.mxu0 %v974_v24  ;;  %p1078_p10 = scmp.ne.s32.totalorder %s770_s7, %s1077_s4  ;;  %p1083_p12 = scmp.lt.s32.totalorder %s1077_s4, %s1077_s4 }
  0x4e   :  { %872 = vmatpush3.bf16.msra.mxu1 %v973_v23 }
  0x4f   :  { %873 = vmatprep.subr.bf16.mxu1 %v976_v26  ;;  %p1084_p13 = por %p1083_p12, %p1082_p11 }
  0x50   :  { %852 = vmatpush3.bf16.msra.mxu0 %v975_v25 }
  0x51   :  { %853 = vmatprep.subr.bf16.mxu0 %v978_v28  ;;  %p1085_p0 = pnand %p1084_p13, %p1078_p10 }
  0x52   :  { %874 = vmatpush3.bf16.msra.mxu1 %v977_v27 }
  0x53   :  { %875 = vmatprep.subr.bf16.mxu1 %v980_v30 }
  0x54   :  { %854 = vmatpush3.bf16.msra.mxu0 %v979_v29 }
  0x55   :  { %883 = vmatprep.subr.bf16.mxu0 %v982_v36 }
  0x56   :  { %876 = vmatpush3.bf16.msra.mxu1 %v981_v33 }
  0x57   :  { %511 = vmatmul.mubr.bf16.vlgmr.msra.gmra.mrb[0].mxu0 %v68_v35  ;;  %916 = vmatprep.subr.bf16.mxu1 %v1110_v44 }
  0x58   :  { %884 = vmatpush3.bf16.msra.mxu0 %v983_v39  ;;  %590 = vmatprep.mubr.bf16.mxu0 %v73_v56 }
  0x59   :  { %551 = vmatmul.mubr.bf16.vlgmr.msra.gmra.mrb[0].mxu1 %v70_v41  ;;  %885 = vmatprep.subr.bf16.mxu0 %v984_v42 }
  0x5a   :  { %918 = vmatprep.mubr.msk.bf16.mxu1 %vm1111_vm0, %v1110_v44  ;;  %917 = vmatpush3.bf16.msra.mxu1 %v998_v53 }
  0x5b   :  { %922 = vmatprep.subr.bf16.mxu1 %v1110_v44 }
  0x5c   :  { %886 = vmatpush3.bf16.msra.mxu0 %v985_v43 }
  0x5d   :  { %887 = vmatprep.subr.bf16.mxu0 %v986_v45 }
  0x60   :  { %888 = vmatpush3.bf16.msra.mxu0 %v987_v46 }
  0x61   :  { %889 = vmatprep.subr.bf16.mxu0 %v988_v47  ;;  %919 = vmatmul.mubr.msk.bf16.vlgmr.msra.gmra.mrb[4].mxu1 %vm474_vm1, %v74_v58 }
  0x62   :  { %938 = vmatprep.mubr.msk.bf16.mxu1 %vm1111_vm0, %v1110_v44  ;;  %923 = vmatpush3.bf16.msra.mxu1 %v999_v0 }
  0x63   :  { %924 = vmatprep.subr.bf16.mxu1 %v1110_v44 }
  0x64   :  { %890 = vmatpush3.bf16.msra.mxu0 %v989_v48 }
  0x65   :  { %891 = vmatprep.subr.bf16.mxu0 %v990_v49 }
  0x66   :  { %925 = vmatpush3.bf16.msra.mxu1 %v1000_v1 }
  0x67   :  { %926 = vmatprep.subr.bf16.mxu1 %v1110_v44 }
  0x68   :  { %892 = vmatpush3.bf16.msra.mxu0 %v991_v50 }
  0x69   :  { %893 = vmatprep.subr.bf16.mxu0 %v992_v51 }
  0x6a   :  { %927 = vmatpush3.bf16.msra.mxu1 %v1001_v2 }
  0x6b   :  { %928 = vmatprep.subr.bf16.mxu1 %v1110_v44 }
  0x6c   :  { %894 = vmatpush3.bf16.msra.mxu0 %v993_v52 }
  0x6d   :  { %895 = vmatprep.subr.bf16.mxu0 %v994_v55 }
  0x6e   :  { %929 = vmatpush3.bf16.msra.mxu1 %v1002_v3 }
  0x6f   :  { %930 = vmatprep.subr.bf16.mxu1 %v1110_v44 }
  0x70   :  { %896 = vmatpush3.bf16.msra.mxu0 %v995_v59 }
  0x71   :  { %897 = vmatprep.subr.bf16.mxu0 %v996_v60 }
  0x72   :  { %931 = vmatpush3.bf16.msra.mxu1 %v1003_v4 }
  0x73   :  { %932 = vmatprep.subr.bf16.mxu1 %v1110_v44 }
  0x74   :  { %898 = vmatpush3.bf16.msra.mxu0 %v997_v61 }
  0x76   :  { %933 = vmatpush3.bf16.msra.mxu1 %v1004_v5 }
  0x77   :  { %591 = vmatmul.mubr.bf16.vlgmr.msra.gmra.mrb[4].mxu0 %v72_v63  ;;  %934 = vmatprep.subr.bf16.mxu1 %v1110_v44 }
  0x7a   :  { %935 = vmatpush3.bf16.msra.mxu1 %v1005_v6 }
  0x7b   :  { %936 = vmatprep.subr.bf16.mxu1 %v1110_v44 }
  0x7e   :  { %937 = vmatpush3.bf16.msra.mxu1 %v1006_v7 }
 0x12a   :  { %v855_v8 = vpop.f32.mrb[0].mxu0 }
 0x12b   :  { %v856_v10 = vpop.f32.mrb[1].mxu0 }
 0x12c   :  { %v857_v11 = vadd.f32 %v856_v10, %v855_v8  ;;  %v858_v12 = vpop.f32.mrb[2].mxu0  ;;  %v877_v13 = vpop.f32.mrb[0].mxu1 }
 0x12d   :  { %v859_v14 = vpop.f32.mrb[3].mxu0  ;;  %v878_v16 = vpop.f32.mrb[1].mxu1 }
 0x12e   :  { %v513_v15 = vadd.f32 %v857_v11, %v779_v9  ;;  %v879_v17 = vadd.f32 %v878_v16, %v877_v13  ;;  %v880_v18 = vpop.f32.mrb[2].mxu1 }
 0x12f   :  { %v881_v19 = vpop.f32.mrb[3].mxu1 }
 0x130   :  { %v553_v20 = vadd.f32 %v879_v17, %v513_v15 }
 0x134   :  { %v632_v21 = vpop.f32.mrb[4].mxu1 }
 0x135   :  { %v920_v22 = vpop.f32.mrb[5].mxu1 }
 0x136   :  { %v635_v23 = vpop.f32.mrb[6].mxu1 }
 0x137   :  { %v921_v24 = vpop.f32.mrb[7].mxu1 }
 0x14a   :  { %v899_v25 = vpop.f32.mrb[4].mxu0 }
 0x14b   :  { %v900_v26 = vpop.f32.mrb[5].mxu0 }
 0x14c   :  { %v901_v27 = vadd.f32 %v900_v26, %v899_v25  ;;  %v902_v28 = vpop.f32.mrb[6].mxu0 }
 0x14d   :  { %v903_v29 = vpop.f32.mrb[7].mxu0 }
 0x14e   :  { %v593_v30 = vadd.f32 %v901_v27, %v553_v20 }
 0x150   :  { %v633_v31 = vadd.f32 %v632_v21, %v593_v30 }
 0x152   :  { %v638_v32 = vmax.f32 %v633_v31, 0.0 }
 0x154   :  { %v639_v33 = vpack.c.bf16 %v638_v32, %v638_v32 }
 0x156   :  { %939 = vmatmul.mubr.bf16.vlgmr.msra.gmra.mrb[8].mxu1 %v639_v33 }
 0x229   :  { %v745_v35 = vpop.f32.mrb[8].mxu1 }
 0x22a   :  { %v746_v36 = vadd.f32 %v830_v34, %v745_v35  ;;  %v940_v37 = vpop.f32.mrb[9].mxu1 }
 0x22b   :  { %v748_v38 = vpop.f32.mrb[10].mxu1 }
 0x22c   :  { %751 = vmax.xlane.f32.xlu0 %v746_v36  ;;  %v941_v39 = vpop.f32.mrb[11].mxu1 }
 0x2b9   :  { %v752_v40 = vpop.xlane.xlu0 %751 }
 0x2ba   :  { %v753_v41 = vsub.f32 %v746_v36, %v752_v40 }
 0x2bc   :  { %v754_v42 = vmul.f32 1.442695, %v753_v41 }
 0x2be   :  { %1007 = vpow2.f32 %v754_v42 }
 0x2c8   :  { %v1008_v43 = vpop.eup %1007 }
 0x2c9   :  { %756 = vadd.xlane.f32.xlu0 %v1008_v43 }
 0x356   :  { %v757_v44 = vpop.xlane.xlu0 %756 }
 0x357   :  { %1009 = vlog2.f32 %v757_v44 }
 0x361   :  { %v1010_v45 = vpop.eup %1009 }
 0x362   :  { %v759_v46 = vmul.f32 0.6931472, %v1010_v45 }
 0x364   :  { %v760_v47 = vsub.f32 %v753_v41, %v759_v46 }
 0x366   :  { %v761_v48 = vpack.c.bf16 %v760_v47, %v760_v47 }
 0x368   :  { %762 = vst [vmem:[#allocation8] sm:$0xf] %v761_v48 }
 0x369   :  { %1088 = shalt.err (!%p1085_p0)
}
 0x36a   :  { %s1089_s10 = scalar_lea.hbm %s1221_s5, 64 }
 0x36b   :  { %p1090_p1 = scmp.ne.s32.totalorder %s1221_s5, %s1089_s10  ;;  %p1093_p2 = scmp.lt.u32.totalorder %s1089_s10, %s1221_s5 }
 0x36d   :  { %p1095_p3 = pnand %p1093_p2, %p1090_p1 }
 0x36f   :  { %1098 = shalt.err (!%p1095_p3)
}
 0x370   :  { %772 = dma.vmem_to_hbm [thread:$0]  %s770_s7, 64, %s1221_s5, [#allocation4]  }
 0x371   :  { %1103 = dma.done.wait [#allocation4], 64  }
 0x372   :  { %1104 = vsyncadd [#allocation4], 4294967232 }
 0x373   :  { %776 = vsyncpa [#allocation3], 1 }
 0x374   :  { %777 = vsyncpa [#allocation6], 1 }
 0x375   :  { %778 = vsyncpa [#allocation4], 1 }

</bundles_post_ra>
